<compile_context>
chip_gen: v7x
topology: tpu7x:2x2x1
jax: 0.10.0
libtpu: 0.0.40
codegen_flags: <defaults>
</compile_context>

<pallas_src>
import functools

import jax
import jax.numpy as jnp
from jax.experimental import pallas as pl
from jax.experimental.pallas import tpu as pltpu


# --------------------------------------------------------------------------
# Kernel
# --------------------------------------------------------------------------
def _decoder_kernel(z_ref, w1_ref, b1_ref, w2_ref, b2_ref, o_ref):
    # fc1: cast z to bf16 at the MXU input (cheap in-kernel VPU pack),
    # accumulate in f32 on the MXU.
    h = jnp.dot(z_ref[...].astype(jnp.bfloat16), w1_ref[...],
                preferred_element_type=jnp.float32)
    # Bias + ReLU. Precision follows b1's dtype: bf16 on v6e/v7x (bf16 VALU,
    # 2x elements per vreg op), f32 on v5e. Numerics are ~unchanged since h
    # is cast to bf16 before fc2 anyway.
    h = jnp.maximum(h.astype(b1_ref.dtype) + b1_ref[...], 0.0)
    # fc2: bf16 at the MXU input, f32 accumulation; bias add in f32.
    out = jnp.dot(h.astype(jnp.bfloat16), w2_ref[...],
                  preferred_element_type=jnp.float32)
    o_ref[...] = (out + b2_ref[...]).astype(o_ref.dtype)


# --------------------------------------------------------------------------
# Helpers (static / Python-side)
# --------------------------------------------------------------------------
def _round_up(x, m):
    return (x + m - 1) // m * m


def _cdiv(a, b):
    return -(-a // b)


def _device_kind():
    try:
        return jax.devices()[0].device_kind.lower()
    except Exception:  # pragma: no cover
        return ""


def _has_bf16_vpu(kind=None):
    kind = _device_kind() if kind is None else kind
    return ("v6" in kind) or ("v7" in kind)


def _target_rows(kind):
    if "v7" in kind:
        return 4096
    if "v6" in kind:
        return 2048
    return 1024  # v5e and anything else


def _vmem_estimate(block_b, L, H, O_pad, out_itemsize, single_buffer_weights):
    nw = 1 if single_buffer_weights else 2
    return (2 * block_b * L * 4                      # z f32, double-buffered
            + 2 * block_b * O_pad * out_itemsize     # out, double-buffered
            + nw * (L * H + H * O_pad) * 2           # bf16 resident weights
            + nw * (H + O_pad) * 4                   # biases
            + block_b * H * 4 + block_b * H * 2)     # f32 h + bf16 copy


_VMEM_BUDGET = 40 << 20   # keep comfortably inside v7x's 64 MiB physical VMEM


def _choose_tiling(B, kind, L, H, O_pad, out_itemsize, single_buffer_weights):
    target = _target_rows(kind)
    steps = max(1, _cdiv(B, target))
    # v7x: need >=2 grid steps so dimension_semantics=("parallel",) can shard
    # the batch axis across the 2 TensorCores.
    if "v7" in kind and B >= 16:
        steps = max(steps, 2)
    while True:
        block_b = max(8, _round_up(_cdiv(B, steps), 8))
        est = _vmem_estimate(block_b, L, H, O_pad, out_itemsize,
                             single_buffer_weights)
        if est <= _VMEM_BUDGET or block_b <= 256:
            break
        steps *= 2
    b_pad = block_b * steps
    vmem_limit = min(64 << 20, max(32 << 20, int(est * 1.5) + (4 << 20)))
    return block_b, b_pad, vmem_limit


# --------------------------------------------------------------------------
# One-time parameter preparation (hoisted out of the per-call path)
# --------------------------------------------------------------------------
def prepare_decoder_params(w1, b1, w2, b2, *, bf16_epilogue=None):
    """Cast weights to bf16 and lane-pad output features to a multiple of 128.

    Call ONCE (e.g. at model load). The per-forward path then launches only
    the pallas_call -- no per-call cast / pad kernels.

    w1: (latent_dim, 512), b1: (512,) or (1, 512)
    w2: (512, output_dim), b2: (output_dim,) or (1, output_dim)
    """
    if bf16_epilogue is None:
        bf16_epilogue = _has_bf16_vpu()
    L, H = w1.shape
    O = w2.shape[-1]
    O_pad = _round_up(O, 128)

    w1p = jnp.asarray(w1, jnp.bfloat16)
    w2p = jnp.asarray(w2, jnp.bfloat16)
    # b1 dtype drives the bias+ReLU epilogue precision inside the kernel.
    b1p = jnp.asarray(b1, jnp.bfloat16 if bf16_epilogue else jnp.float32)
    b1p = b1p.reshape(1, H)
    b2p = jnp.asarray(b2, jnp.float32).reshape(1, O)
    if O_pad != O:
        w2p = jnp.pad(w2p, ((0, 0), (0, O_pad - O)))
        b2p = jnp.pad(b2p, ((0, 0), (0, O_pad - O)))

    return {"w1": w1p, "b1": b1p, "w2": w2p, "b2": b2p,
            "latent_dim": L, "hidden_dim": H,
            "output_dim": O, "padded_output_dim": O_pad}


# --------------------------------------------------------------------------
# Forward
# --------------------------------------------------------------------------
@functools.partial(
    jax.jit,
    static_argnames=("block_b", "b_pad", "out_dim", "out_dtype",
                     "single_buffer_weights", "vmem_limit_bytes",
                     "trim_output"))
def _decoder_call(z, w1, b1, w2, b2, *, block_b, b_pad, out_dim, out_dtype,
                  single_buffer_weights, vmem_limit_bytes, trim_output):
    B, L = z.shape
    H = w1.shape[1]
    O_pad = w2.shape[1]
    out_itemsize = jnp.dtype(out_dtype).itemsize

    if b_pad != B:
        z = jnp.pad(z, ((0, b_pad - B), (0, 0)))

    grid = (b_pad // block_b,)

    # Resident-weight specs: single-buffer only when the weights are large
    # enough that double-buffering them would pressure VMEM (large output_dim).
    w_mode = pl.Buffered(1) if single_buffer_weights else None

    def _resident(shape):
        if w_mode is None:
            return pl.BlockSpec(shape, lambda i: (0, 0))
        return pl.BlockSpec(shape, lambda i: (0, 0), pipeline_mode=w_mode)

    flops = 2 * b_pad * (L * H + H * O_pad)
    bytes_accessed = (b_pad * L * 4                       # z (f32)
                      + L * H * 2 + H * O_pad * 2         # bf16 weights
                      + H * b1.dtype.itemsize + O_pad * 4  # biases
                      + b_pad * O_pad * out_itemsize)     # output

    out = pl.pallas_call(
        _decoder_kernel,
        out_shape=jax.ShapeDtypeStruct((b_pad, O_pad), out_dtype),
        grid_spec=pl.GridSpec(
            grid=grid,
            in_specs=[
                pl.BlockSpec((block_b, L), lambda i: (i, 0)),  # z tile
                _resident((L, H)),                             # w1 (resident)
                _resident((1, H)),                             # b1
                _resident((H, O_pad)),                         # w2 (resident)
                _resident((1, O_pad)),                         # b2
            ],
            out_specs=pl.BlockSpec((block_b, O_pad), lambda i: (i, 0)),
        ),
        compiler_params=pltpu.CompilerParams(
            # Grid axis is pure batch parallelism (megacore when >1 step).
            dimension_semantics=("parallel",),
            vmem_limit_bytes=vmem_limit_bytes,
        ),
        cost_estimate=pl.CostEstimate(
            flops=flops, transcendentals=0, bytes_accessed=bytes_accessed),
    )(z, w1, b1, w2, b2)

    if trim_output and (b_pad != B or O_pad != out_dim):
        # Exact nn.Module semantics. For large, mem-bound batches prefer
        # trim_output=False and let the consumer slice/fuse the padded output
        # (avoids a full extra read+write of the result).
        out = out[:B, :out_dim]
    return out


def decoder_forward(z, params, *, block_b=None, out_dtype=jnp.float32,
                    trim_output=True):
    """Fused MLP decoder forward.

    z:      (B, latent_dim) float32
    params: output of prepare_decoder_params (bf16 weights, lane-padded).
    returns (B, output_dim) in out_dtype (float32 by default).
    """
    B, L = z.shape
    H = params["hidden_dim"]
    O = params["output_dim"]
    O_pad = params["padded_output_dim"]
    kind = _device_kind()
    out_itemsize = jnp.dtype(out_dtype).itemsize

    # Single-buffer resident weights only when their double-buffered footprint
    # is significant (generic decoders with large output_dim).
    single_buffer_weights = (L * H + H * O_pad) * 2 > (4 << 20)

    if block_b is None:
        block_b, b_pad, vmem_limit = _choose_tiling(
            B, kind, L, H, O_pad, out_itemsize, single_buffer_weights)
    else:
        block_b = max(8, _round_up(block_b, 8))
        b_pad = _round_up(B, block_b)
        est = _vmem_estimate(block_b, L, H, O_pad, out_itemsize,
                             single_buffer_weights)
        vmem_limit = min(64 << 20, max(32 << 20, int(est * 1.5) + (4 << 20)))

    return _decoder_call(
        z, params["w1"], params["b1"], params["w2"], params["b2"],
        block_b=block_b, b_pad=b_pad, out_dim=O, out_dtype=out_dtype,
        single_buffer_weights=single_buffer_weights,
        vmem_limit_bytes=vmem_limit, trim_output=trim_output)


# --------------------------------------------------------------------------
# Demo / self-test
# --------------------------------------------------------------------------
def _init_params(key, latent_dim, hidden_dim, output_dim):
    """Deterministic init mimicking nn.Linear's uniform(-1/sqrt(in), 1/sqrt(in))."""
    k1, k2, k3, k4 = jax.random.split(key, 4)
    bound1 = 1.0 / jnp.sqrt(latent_dim)
    bound2 = 1.0 / jnp.sqrt(hidden_dim)
    w1 = jax.random.uniform(k1, (latent_dim, hidden_dim), jnp.float32,
                            -bound1, bound1)
    b1 = jax.random.uniform(k2, (1, hidden_dim), jnp.float32, -bound1, bound1)
    w2 = jax.random.uniform(k3, (hidden_dim, output_dim), jnp.float32,
                            -bound2, bound2)
    b2 = jax.random.uniform(k4, (1, output_dim), jnp.float32, -bound2, bound2)
    return w1, b1, w2, b2


if __name__ == "__main__":
    # Small shapes consistent with the module's forward: z is (batch, latent_dim).
    # output_dim deliberately not 128-aligned to exercise the (hoisted) lane-pad path.
    batch = 64
    latent_dim = 32
    hidden_dim = 512
    output_dim = 96

    key = jax.random.PRNGKey(0)
    kz, kp = jax.random.split(key)
    z = jax.random.normal(kz, (batch, latent_dim), jnp.float32)
    w1, b1, w2, b2 = _init_params(kp, latent_dim, hidden_dim, output_dim)

    # One-time parameter prep (bf16 cast + lane pad) -- NOT in the per-call path.
    params = prepare_decoder_params(w1, b1, w2, b2)

    out = decoder_forward(z, params)
    out = jax.block_until_ready(out)
    assert out.shape == (batch, output_dim)
    assert out.dtype == jnp.float32

    # Reference 1: matched mixed-precision math in plain JAX (same bf16-at-MXU
    # inputs, same epilogue dtype as the kernel picked for this device).
    h_ref = jnp.dot(z.astype(jnp.bfloat16), params["w1"],
                    preferred_element_type=jnp.float32)
    h_ref = jnp.maximum(h_ref.astype(params["b1"].dtype) + params["b1"], 0.0)
    ref_mp = jnp.dot(h_ref.astype(jnp.bfloat16), params["w2"][:, :output_dim],
                     preferred_element_type=jnp.float32) + b2
    assert jnp.allclose(out, ref_mp, atol=2e-2, rtol=2e-2)

    # Reference 2: full-f32 PyTorch-equivalent math (loose tol for bf16 inputs).
    ref_f32 = jnp.maximum(z @ w1 + b1, 0.0) @ w2 + b2
    assert jnp.allclose(out, ref_f32, atol=5e-2, rtol=5e-2)

    print("KERNEL_OK")
</pallas_src>

<mosaic_0001>
module attributes {stable_mosaic.version = 11 : i64} {
  func.func @_decoder_kernel(%arg0: i32, %arg1: memref<64x32xf32, #tpu.memory_space<vmem>>, %arg2: memref<32x512xbf16, #tpu.memory_space<vmem>>, %arg3: memref<1x512xf32, #tpu.memory_space<vmem>>, %arg4: memref<512x128xbf16, #tpu.memory_space<vmem>>, %arg5: memref<1x128xf32, #tpu.memory_space<vmem>>, %arg6: memref<64x128xf32, #tpu.memory_space<vmem>>) attributes {dimension_semantics = [#tpu.dimension_semantics<parallel>], iteration_bounds = array<i64: 1>, scalar_prefetch = 0 : i64, scratch_operands = 0 : i64, tpu.core_type = #tpu.core_type<tc>, window_params = [{transform_indices = @transform_0, window_bounds = array<i64: 64, 32>}, {pipeline_mode = #tpu.pipeline_mode<synchronous>, transform_indices = @transform_1, window_bounds = array<i64: 32, 512>}, {pipeline_mode = #tpu.pipeline_mode<synchronous>, transform_indices = @transform_2, window_bounds = array<i64: 1, 512>}, {pipeline_mode = #tpu.pipeline_mode<synchronous>, transform_indices = @transform_3, window_bounds = array<i64: 512, 128>}, {pipeline_mode = #tpu.pipeline_mode<synchronous>, transform_indices = @transform_4, window_bounds = array<i64: 1, 128>}, {transform_indices = @transform_5, window_bounds = array<i64: 64, 128>}]} {
    %c0 = arith.constant 0 : index
    %c0_0 = arith.constant 0 : index
    %0 = vector.load %arg1[%c0, %c0_0] : memref<64x32xf32, #tpu.memory_space<vmem>>, vector<64x32xf32>
    %1 = arith.truncf %0 : vector<64x32xf32> to vector<64x32xbf16>
    %c0_1 = arith.constant 0 : index
    %c0_2 = arith.constant 0 : index
    %2 = vector.load %arg2[%c0_1, %c0_2] : memref<32x512xbf16, #tpu.memory_space<vmem>>, vector<32x512xbf16>
    %cst = arith.constant dense<0.000000e+00> : vector<64x512xf32>
    %3 = tpu.matmul %1, %2, %cst {dimension_numbers = #tpu.dot_dimension_numbers<[1], [0], [0], [1], [0, 0, 1, 1], [], []>} : vector<64x32xbf16>, vector<32x512xbf16>, vector<64x512xf32> -> vector<64x512xf32>
    %c0_3 = arith.constant 0 : index
    %c0_4 = arith.constant 0 : index
    %4 = vector.load %arg3[%c0_3, %c0_4] : memref<1x512xf32, #tpu.memory_space<vmem>>, vector<1x512xf32>
    %5 = vector.broadcast %4 : vector<1x512xf32> to vector<64x512xf32>
    %6 = arith.addf %3, %5 : vector<64x512xf32>
    %cst_5 = arith.constant 0.000000e+00 : f32
    %7 = vector.broadcast %cst_5 : f32 to vector<64x512xf32>
    %8 = arith.maximumf %6, %7 : vector<64x512xf32>
    %9 = arith.truncf %8 : vector<64x512xf32> to vector<64x512xbf16>
    %c0_6 = arith.constant 0 : index
    %c0_7 = arith.constant 0 : index
    %10 = vector.load %arg4[%c0_6, %c0_7] : memref<512x128xbf16, #tpu.memory_space<vmem>>, vector<512x128xbf16>
    %cst_8 = arith.constant dense<0.000000e+00> : vector<64x128xf32>
    %11 = tpu.matmul %9, %10, %cst_8 {dimension_numbers = #tpu.dot_dimension_numbers<[1], [0], [0], [1], [0, 0, 1, 1], [], []>} : vector<64x512xbf16>, vector<512x128xbf16>, vector<64x128xf32> -> vector<64x128xf32>
    %c0_9 = arith.constant 0 : index
    %c0_10 = arith.constant 0 : index
    %12 = vector.load %arg5[%c0_9, %c0_10] : memref<1x128xf32, #tpu.memory_space<vmem>>, vector<1x128xf32>
    %13 = vector.broadcast %12 : vector<1x128xf32> to vector<64x128xf32>
    %14 = arith.addf %11, %13 : vector<64x128xf32>
    %c0_11 = arith.constant 0 : index
    %c0_12 = arith.constant 0 : index
    %15 = vector.load %arg6[%c0_11, %c0_12] : memref<64x128xf32, #tpu.memory_space<vmem>>, vector<64x128xf32>
    tpu.vector_store %arg6[%c0_11, %c0_12], %14 {strides = array<i32>} : memref<64x128xf32, #tpu.memory_space<vmem>>, vector<64x128xf32>,
    return
  }
  func.func @transform_0(%arg0: i32) -> (i32, i32) {
    %c0_i32 = arith.constant 0 : i32
    %c0_i32_0 = arith.constant 0 : i32
    return %arg0, %c0_i32 : i32, i32
  }
  func.func @transform_1(%arg0: i32) -> (i32, i32) {
    %c0_i32 = arith.constant 0 : i32
    %c0_i32_0 = arith.constant 0 : i32
    %c0_i32_1 = arith.constant 0 : i32
    return %c0_i32, %c0_i32_0 : i32, i32
  }
  func.func @transform_2(%arg0: i32) -> (i32, i32) {
    %c0_i32 = arith.constant 0 : i32
    %c0_i32_0 = arith.constant 0 : i32
    %c0_i32_1 = arith.constant 0 : i32
    return %c0_i32, %c0_i32_0 : i32, i32
  }
  func.func @transform_3(%arg0: i32) -> (i32, i32) {
    %c0_i32 = arith.constant 0 : i32
    %c0_i32_0 = arith.constant 0 : i32
    %c0_i32_1 = arith.constant 0 : i32
    return %c0_i32, %c0_i32_0 : i32, i32
  }
  func.func @transform_4(%arg0: i32) -> (i32, i32) {
    %c0_i32 = arith.constant 0 : i32
    %c0_i32_0 = arith.constant 0 : i32
    %c0_i32_1 = arith.constant 0 : i32
    return %c0_i32, %c0_i32_0 : i32, i32
  }
  func.func @transform_5(%arg0: i32) -> (i32, i32) {
    %c0_i32 = arith.constant 0 : i32
    %c0_i32_0 = arith.constant 0 : i32
    return %arg0, %c0_i32 : i32, i32
  }
}

</mosaic_0001>

<bundles_post_ra>
// kernel: _decoder_call.1
= control target key start
LH: loop header
LB: loop body
LE: loop exit
PB: predicated region body
PF: predicated region fallthrough
CT: control target
= control target key end

     0   :  { %10 = vsyncpa [#allocation3], 0  ;;  %s1152_s0 = inlined_call_operand.vmem [shape: f32[64,32], index: 0, kind: input, shape index: {}]   ;;  %s1153_s1 = inlined_call_operand.vmem [shape: bf16[32,512], index: 1, kind: input, shape index: {}]   ;;  %s1154_s2 = inlined_call_operand.vmem [shape: f32[1,512], index: 2, kind: input, shape index: {}]   ;;  %s1155_s3 = inlined_call_operand.hbm [shape: bf16[512,128], index: 3, kind: input, shape index: {}]   ;;  %s1156_s4 = inlined_call_operand.vmem [shape: f32[1,128], index: 4, kind: input, shape index: {}]   ;;  %s1157_s5 = inlined_call_operand.hbm [shape: f32[64,128], index: 5, kind: output, shape index: {}]  }
   0x1   :  { %11 = vsyncpa [#allocation4], 0  ;;  %s971_s18 = smov [#allocation2]   ;;  %s923_s22 = scalar_lea.hbm %s1155_s3, 4096 }
   0x2   :  { %s23_s19 = sshll.u32 %s971_s18, 4  ;;  %p924_p0 = scmp.ne.s32.totalorder %s1155_s3, %s923_s22  ;;  %s24_s19 = int_to_ptr.vmem [resolvable:$true] %s23_s19 }
   0x3   :  { %p927_p1 = scmp.lt.u32.totalorder %s923_s22, %s1155_s3 }
   0x5   :  { %p929_p2 = pnand %p927_p1, %p924_p0 }
   0x7   :  { %932 = shalt.err (!%p929_p2)
}
   0x8   :  { %s933_s27 = scalar_lea.vmem %s24_s19, 4096  ;;  %p938_p4 = scmp.lt.s32.totalorder %s24_s19, %s24_s19 }
   0x9   :  { %p934_p3 = scmp.ne.s32.totalorder %s24_s19, %s933_s27  ;;  %p939_p5 = scmp.lt.s32.totalorder %s933_s27, %s933_s27 }
   0xb   :  { %p940_p6 = por %p939_p5, %p938_p4 }
   0xd   :  { %p941_p7 = pnand %p940_p6, %p934_p3 }
   0xf   :  { %944 = shalt.err (!%p941_p7)
}
  0x10   :  { %s972_s28 = smov 64   ;;  %s973_s29 = smov 4  }
  0x11   :  { %29 = dma.hbm_to_vmem [thread:$0]  %s1155_s3, 4096, %s24_s19, [#allocation3], %s972_s28, %s972_s28, %s973_s29  }
  0x12   :  { %967 = dma.done.wait [#allocation3], 4096  }
  0x13   :  { %968 = vsyncadd [#allocation3], 4294963200  ;;  %v974_v0 = vmov 0   ;;  %v879_v1 = vld [vmem:[%s1153_s1 + $0x4] ss:$16 sps:$4 sm:$0xff]   ;;  %v37_v10 = vld [vmem:[%s1152_s0 + $0x8] sm:$0xff]  ;;  %v58_v53 = vlaneseq }
  0x14   :  { %163 = vmatprep.mubr.bf16.mxu0 %v974_v0  ;;  %236 = vmatprep.mubr.bf16.mxu1 %v974_v0  ;;  %v881_v2 = vld [vmem:[%s1153_s1 + $0xc] ss:$16 sps:$4 sm:$0xff]   ;;  %v883_v3 = vld [vmem:[%s1153_s1] ss:$16 sps:$4 sm:$0xff]   ;;  %v884_v4 = vld [vmem:[%s1153_s1 + $0x8] ss:$16 sps:$4 sm:$0xff]  }
  0x15   :  { %131 = vmatprep.subr.bf16.mxu0 %v879_v1  ;;  %204 = vmatprep.subr.bf16.mxu1 %v881_v2  ;;  %v885_v5 = vld [vmem:[%s1153_s1 + $0x24] ss:$16 sps:$4 sm:$0xff]   ;;  %v887_v6 = vld [vmem:[%s1153_s1 + $0x2c] ss:$16 sps:$4 sm:$0xff]   ;;  %v889_v7 = vld [vmem:[%s1153_s1 + $0x20] ss:$16 sps:$4 sm:$0xff]  }
  0x16   :  { %132 = vmatpush1.bf16.msra.mxu0 %v883_v3  ;;  %205 = vmatpush1.bf16.msra.mxu1 %v884_v4  ;;  %v890_v8 = vld [vmem:[%s1153_s1 + $0x28] ss:$16 sps:$4 sm:$0xff]   ;;  %v36_v9 = vld [vmem:[%s1152_s0] sm:$0xff]  ;;  %vm118_vm0 = vcmask 261120   ;;  %v38_v14 = vld [vmem:[%s1152_s0 + $0x10] sm:$0xff]  ;;  %v59_v54 = vshrl.u32 %v58_v53, 7 }
  0x17   :  { %133 = vmatprep.subr.bf16.mxu0 %v885_v5  ;;  %206 = vmatprep.subr.bf16.mxu1 %v887_v6  ;;  %v44_v11 = vpack.c.bf16 %v37_v10, %v36_v9  ;;  %v891_v12 = vld [vmem:[#allocation2 + $0x40] sm:$0xff]   ;;  %v39_v15 = vld [vmem:[%s1152_s0 + $0x18] sm:$0xff]  ;;  %v895_v18 = vld [vmem:[#allocation2 + $0x48] sm:$0xff]  }
  0x18   :  { %v892_v13 = vld [vmem:[#allocation2] sm:$0xff]   ;;  %v896_v19 = vld [vmem:[#allocation2 + $0x8] sm:$0xff]   ;;  %v45_v21 = vpack.c.bf16 %v39_v15, %v38_v14  ;;  %v899_v23 = vld [vmem:[#allocation2 + $0x50] sm:$0xff]   ;;  %v60_v55 = vsub.s32 0, %v59_v54  ;;  %v68_v56 = vsub.s32 2, %v59_v54  ;;  %v64_v58 = vsub.s32 1, %v59_v54 }
  0x19   :  { %v893_v16 = vld [vmem:[#allocation2 + $0xc0] sm:$0xff]   ;;  %v897_v20 = vld [vmem:[#allocation2 + $0xc8] sm:$0xff]   ;;  %v900_v24 = vld [vmem:[#allocation2 + $0x10] sm:$0xff]   ;;  %v72_v59 = vsub.s32 3, %v59_v54 }
  0x1a   :  { %134 = vmatpush1.bf16.msra.mxu0 %v889_v7  ;;  %207 = vmatpush1.bf16.msra.mxu1 %v890_v8  ;;  %v894_v17 = vld [vmem:[#allocation2 + $0x80] sm:$0xff]   ;;  %v898_v22 = vld [vmem:[#allocation2 + $0x88] sm:$0xff]   ;;  %v901_v27 = vld [vmem:[#allocation2 + $0xd0] sm:$0xff]  }
  0x1b   :  { %792 = vmatprep.subr.bf16.mxu0 %v891_v12  ;;  %832 = vmatprep.subr.bf16.mxu1 %v893_v16  ;;  %v40_v25 = vld [vmem:[%s1152_s0 + $0x20] sm:$0xff]  ;;  %v41_v26 = vld [vmem:[%s1152_s0 + $0x28] sm:$0xff]  ;;  %v902_v28 = vld [vmem:[#allocation2 + $0x90] sm:$0xff]  }
  0x1c   :  { %v903_v29 = vld [vmem:[#allocation2 + $0x58] sm:$0xff]   ;;  %v46_v32 = vpack.c.bf16 %v41_v26, %v40_v25  ;;  %v907_v34 = vld [vmem:[#allocation2 + $0x60] sm:$0xff]   ;;  %v42_v36 = vld [vmem:[%s1152_s0 + $0x30] sm:$0xff] }
  0x1d   :  { %751 = vmatmul.mubr.msk.bf16.vlgmr.msra.gmra.mrb[0].mxu0 %vm118_vm0, %v44_v11  ;;  %755 = vmatmul.mubr.msk.bf16.vlgmr.msra.gmra.mrb[0].mxu1 %vm118_vm0, %v44_v11  ;;  %v904_v30 = vld [vmem:[#allocation2 + $0x18] sm:$0xff]   ;;  %v908_v35 = vld [vmem:[#allocation2 + $0x20] sm:$0xff]   ;;  %v911_v40 = vld [vmem:[#allocation2 + $0x68] sm:$0xff]  }
  0x1e   :  { %173 = vmatprep.mubr.bf16.mxu0 %v974_v0  ;;  %246 = vmatprep.mubr.bf16.mxu1 %v974_v0  ;;  %v905_v31 = vld [vmem:[#allocation2 + $0xd8] sm:$0xff]   ;;  %v909_v38 = vld [vmem:[#allocation2 + $0xe0] sm:$0xff]   ;;  %v912_v41 = vld [vmem:[#allocation2 + $0x28] sm:$0xff]  }
  0x1f   :  { %793 = vmatpush3.bf16.msra.mxu0 %v892_v13  ;;  %833 = vmatpush3.bf16.msra.mxu1 %v894_v17  ;;  %v906_v33 = vld [vmem:[#allocation2 + $0x98] sm:$0xff]   ;;  %v910_v39 = vld [vmem:[#allocation2 + $0xa0] sm:$0xff]   ;;  %v913_v42 = vld [vmem:[#allocation2 + $0xe8] sm:$0xff]  }
  0x20   :  { %794 = vmatprep.subr.bf16.mxu0 %v895_v18  ;;  %834 = vmatprep.subr.bf16.mxu1 %v897_v20  ;;  %v43_v37 = vld [vmem:[%s1152_s0 + $0x38] sm:$0xff]  ;;  %v914_v44 = vld [vmem:[#allocation2 + $0xa8] sm:$0xff]   ;;  %v915_v45 = vld [vmem:[#allocation2 + $0x70] sm:$0xff]  }
  0x21   :  { %v47_v43 = vpack.c.bf16 %v43_v37, %v42_v36  ;;  %v917_v46 = vld [vmem:[#allocation2 + $0xf0] sm:$0xff]   ;;  %v919_v49 = vld [vmem:[#allocation2 + $0x78] sm:$0xff]   ;;  %v56_v57 = vld [vmem:[%s1154_s2] sm:$0xf] }
  0x22   :  { %v916_v47 = vld [vmem:[#allocation2 + $0x30] sm:$0xff]   ;;  %v921_v50 = vld [vmem:[#allocation2 + $0xf8] sm:$0xff]   ;;  %v1087_v60 = vrot.slane %v56_v57, %v60_v55  ;;  %v1089_v61 = vrot.slane %v56_v57, %v68_v56  ;;  %v1091_v62 = vrot.slane %v56_v57, %v64_v58  ;;  %v1093_v63 = vrot.slane %v56_v57, %v72_v59 }
  0x23   :  { %795 = vmatpush3.bf16.msra.mxu0 %v896_v19  ;;  %835 = vmatpush3.bf16.msra.mxu1 %v898_v22  ;;  %v918_v48 = vld [vmem:[#allocation2 + $0xb0] sm:$0xff]   ;;  %v920_v51 = vld [vmem:[#allocation2 + $0x38] sm:$0xff]  }
  0x24   :  { %796 = vmatprep.subr.bf16.mxu0 %v899_v23  ;;  %836 = vmatprep.subr.bf16.mxu1 %v901_v27  ;;  %v922_v52 = vld [vmem:[#allocation2 + $0xb8] sm:$0xff]  }
  0x25   :  { %752 = vmatmul.mubr.msk.bf16.gmra.mrb[4].mxu0 %vm118_vm0, %v45_v21  ;;  %756 = vmatmul.mubr.msk.bf16.gmra.mrb[4].mxu1 %vm118_vm0, %v45_v21 }
  0x26   :  { %183 = vmatprep.mubr.bf16.mxu0 %v974_v0  ;;  %256 = vmatprep.mubr.bf16.mxu1 %v974_v0 }
  0x27   :  { %797 = vmatpush3.bf16.msra.mxu0 %v900_v24  ;;  %837 = vmatpush3.bf16.msra.mxu1 %v902_v28 }
  0x28   :  { %798 = vmatprep.subr.bf16.mxu0 %v903_v29  ;;  %838 = vmatprep.subr.bf16.mxu1 %v905_v31 }
  0x2b   :  { %799 = vmatpush3.bf16.msra.mxu0 %v904_v30  ;;  %839 = vmatpush3.bf16.msra.mxu1 %v906_v33 }
  0x2c   :  { %800 = vmatprep.subr.bf16.mxu0 %v907_v34  ;;  %840 = vmatprep.subr.bf16.mxu1 %v909_v38 }
  0x2d   :  { %753 = vmatmul.mubr.msk.bf16.gmra.mrb[8].mxu0 %vm118_vm0, %v46_v32  ;;  %757 = vmatmul.mubr.msk.bf16.gmra.mrb[8].mxu1 %vm118_vm0, %v46_v32 }
  0x2e   :  { %193 = vmatprep.mubr.bf16.mxu0 %v974_v0  ;;  %266 = vmatprep.mubr.bf16.mxu1 %v974_v0 }
  0x2f   :  { %801 = vmatpush3.bf16.msra.mxu0 %v908_v35  ;;  %841 = vmatpush3.bf16.msra.mxu1 %v910_v39 }
  0x30   :  { %802 = vmatprep.subr.bf16.mxu0 %v911_v40  ;;  %842 = vmatprep.subr.bf16.mxu1 %v913_v42 }
  0x33   :  { %803 = vmatpush3.bf16.msra.mxu0 %v912_v41  ;;  %843 = vmatpush3.bf16.msra.mxu1 %v914_v44 }
  0x34   :  { %804 = vmatprep.subr.bf16.mxu0 %v915_v45  ;;  %844 = vmatprep.subr.bf16.mxu1 %v917_v46 }
  0x35   :  { %754 = vmatmul.mubr.msk.bf16.gmra.mrb[12].mxu0 %vm118_vm0, %v47_v43  ;;  %758 = vmatmul.mubr.msk.bf16.gmra.mrb[12].mxu1 %vm118_vm0, %v47_v43 }
  0x37   :  { %805 = vmatpush3.bf16.msra.mxu0 %v916_v47  ;;  %845 = vmatpush3.bf16.msra.mxu1 %v918_v48 }
  0x38   :  { %806 = vmatprep.subr.bf16.mxu0 %v919_v49  ;;  %846 = vmatprep.subr.bf16.mxu1 %v921_v50 }
  0x3b   :  { %807 = vmatpush3.bf16.msra.mxu0 %v920_v51  ;;  %847 = vmatpush3.bf16.msra.mxu1 %v922_v52 }
  0xf0   :  { %v165_v0 = vpop.f32.mrb[0].mxu0  ;;  %v238_v1 = vpop.f32.mrb[0].mxu1 }
  0xf1   :  { %v166_v2 = vadd.f32 %v165_v0, %v1087_v60  ;;  %v239_v3 = vadd.f32 %v238_v1, %v1089_v61  ;;  %v167_v4 = vpop.f32.mrb[1].mxu0  ;;  %v240_v5 = vpop.f32.mrb[1].mxu1 }
  0xf2   :  { %v168_v6 = vadd.f32 %v167_v4, %v1091_v62  ;;  %v241_v7 = vadd.f32 %v240_v5, %v1093_v63  ;;  %v169_v8 = vpop.f32.mrb[2].mxu0  ;;  %v242_v9 = vpop.f32.mrb[2].mxu1 }
  0xf3   :  { %v279_v10 = vmax.f32 %v239_v3, 0.0  ;;  %v170_v11 = vadd.f32 %v169_v8, %v1087_v60  ;;  %v243_v12 = vadd.f32 %v242_v9, %v1089_v61  ;;  %v171_v13 = vpop.f32.mrb[3].mxu0  ;;  %v244_v14 = vpop.f32.mrb[3].mxu1  ;;  %v277_v18 = vmax.f32 %v166_v2, 0.0 }
  0xf4   :  { %v280_v15 = vmax.f32 %v241_v7, 0.0  ;;  %v172_v16 = vadd.f32 %v171_v13, %v1091_v62  ;;  %v245_v17 = vadd.f32 %v244_v14, %v1093_v63  ;;  %v278_v21 = vmax.f32 %v168_v6, 0.0 }
  0xf5   :  { %v281_v19 = vmax.f32 %v170_v11, 0.0  ;;  %v283_v20 = vmax.f32 %v243_v12, 0.0 }
  0xf6   :  { %v282_v22 = vmax.f32 %v172_v16, 0.0  ;;  %v284_v23 = vmax.f32 %v245_v17, 0.0 }
  0xf7   :  { %v309_v24 = vpack.c.bf16 %v281_v19, %v277_v18  ;;  %v311_v25 = vpack.c.bf16 %v283_v20, %v279_v10 }
  0xf8   :  { %v310_v26 = vpack.c.bf16 %v282_v22, %v278_v21  ;;  %v312_v27 = vpack.c.bf16 %v284_v23, %v280_v15  ;;  %v175_v28 = vpop.f32.mrb[4].mxu0  ;;  %v248_v29 = vpop.f32.mrb[4].mxu1 }
  0xf9   :  { %v176_v30 = vadd.f32 %v175_v28, %v1087_v60  ;;  %v249_v31 = vadd.f32 %v248_v29, %v1089_v61  ;;  %v177_v32 = vpop.f32.mrb[5].mxu0  ;;  %v250_v33 = vpop.f32.mrb[5].mxu1 }
  0xfa   :  { %v178_v34 = vadd.f32 %v177_v32, %v1091_v62  ;;  %v251_v35 = vadd.f32 %v250_v33, %v1093_v63  ;;  %v179_v36 = vpop.f32.mrb[6].mxu0  ;;  %v252_v37 = vpop.f32.mrb[6].mxu1  ;;  %620 = vmatprep.mubr.bf16.mxu0 %v310_v26  ;;  %685 = vmatprep.mubr.bf16.mxu1 %v312_v27 }
  0xfb   :  { %v287_v38 = vmax.f32 %v249_v31, 0.0  ;;  %v180_v39 = vadd.f32 %v179_v36, %v1087_v60  ;;  %v253_v40 = vadd.f32 %v252_v37, %v1089_v61  ;;  %v181_v41 = vpop.f32.mrb[7].mxu0  ;;  %v254_v42 = vpop.f32.mrb[7].mxu1  ;;  %621 = vmatmul.mubr.bf16.vlgmr.msra.gmra.mrb[16].mxu0 %v309_v24  ;;  %686 = vmatmul.mubr.bf16.vlgmr.msra.gmra.mrb[16].mxu1 %v311_v25  ;;  %v285_v46 = vmax.f32 %v176_v30, 0.0 }
  0xfc   :  { %v288_v43 = vmax.f32 %v251_v35, 0.0  ;;  %v182_v44 = vadd.f32 %v181_v41, %v1091_v62  ;;  %v255_v45 = vadd.f32 %v254_v42, %v1093_v63  ;;  %v286_v49 = vmax.f32 %v178_v34, 0.0 }
  0xfd   :  { %v289_v47 = vmax.f32 %v180_v39, 0.0  ;;  %v291_v48 = vmax.f32 %v253_v40, 0.0 }
  0xfe   :  { %v290_v50 = vmax.f32 %v182_v44, 0.0  ;;  %v292_v51 = vmax.f32 %v255_v45, 0.0 }
  0xff   :  { %v313_v52 = vpack.c.bf16 %v289_v47, %v285_v46  ;;  %v315_v53 = vpack.c.bf16 %v291_v48, %v287_v38 }
 0x100   :  { %v314_v54 = vpack.c.bf16 %v290_v50, %v286_v49  ;;  %v316_v55 = vpack.c.bf16 %v292_v51, %v288_v43  ;;  %v185_v56 = vpop.f32.mrb[8].mxu0  ;;  %v258_v57 = vpop.f32.mrb[8].mxu1 }
 0x101   :  { %v186_v58 = vadd.f32 %v185_v56, %v1087_v60  ;;  %v259_v59 = vadd.f32 %v258_v57, %v1089_v61  ;;  %v187_v0 = vpop.f32.mrb[9].mxu0  ;;  %v260_v1 = vpop.f32.mrb[9].mxu1 }
 0x102   :  { %v188_v2 = vadd.f32 %v187_v0, %v1091_v62  ;;  %v261_v3 = vadd.f32 %v260_v1, %v1093_v63  ;;  %v189_v4 = vpop.f32.mrb[10].mxu0  ;;  %v262_v5 = vpop.f32.mrb[10].mxu1  ;;  %628 = vmatprep.mubr.bf16.mxu0 %v314_v54  ;;  %693 = vmatprep.mubr.bf16.mxu1 %v316_v55 }
 0x103   :  { %v295_v6 = vmax.f32 %v259_v59, 0.0  ;;  %v190_v7 = vadd.f32 %v189_v4, %v1087_v60  ;;  %v263_v8 = vadd.f32 %v262_v5, %v1089_v61  ;;  %v191_v9 = vpop.f32.mrb[11].mxu0  ;;  %v264_v10 = vpop.f32.mrb[11].mxu1  ;;  %629 = vmatmul.mubr.bf16.gmra.mrb[20].mxu0 %v313_v52  ;;  %694 = vmatmul.mubr.bf16.gmra.mrb[20].mxu1 %v315_v53  ;;  %v293_v14 = vmax.f32 %v186_v58, 0.0 }
 0x104   :  { %v296_v11 = vmax.f32 %v261_v3, 0.0  ;;  %v192_v12 = vadd.f32 %v191_v9, %v1091_v62  ;;  %v265_v13 = vadd.f32 %v264_v10, %v1093_v63  ;;  %v294_v17 = vmax.f32 %v188_v2, 0.0 }
 0x105   :  { %v297_v15 = vmax.f32 %v190_v7, 0.0  ;;  %v299_v16 = vmax.f32 %v263_v8, 0.0 }
 0x106   :  { %v298_v18 = vmax.f32 %v192_v12, 0.0  ;;  %v300_v19 = vmax.f32 %v265_v13, 0.0 }
 0x107   :  { %v317_v20 = vpack.c.bf16 %v297_v15, %v293_v14  ;;  %v319_v21 = vpack.c.bf16 %v299_v16, %v295_v6 }
 0x108   :  { %v318_v22 = vpack.c.bf16 %v298_v18, %v294_v17  ;;  %v320_v23 = vpack.c.bf16 %v300_v19, %v296_v11  ;;  %v195_v24 = vpop.f32.mrb[12].mxu0  ;;  %v268_v25 = vpop.f32.mrb[12].mxu1 }
 0x109   :  { %v196_v26 = vadd.f32 %v195_v24, %v1087_v60  ;;  %v269_v27 = vadd.f32 %v268_v25, %v1089_v61  ;;  %v197_v28 = vpop.f32.mrb[13].mxu0  ;;  %v270_v29 = vpop.f32.mrb[13].mxu1 }
 0x10a   :  { %v198_v30 = vadd.f32 %v197_v28, %v1091_v62  ;;  %v271_v31 = vadd.f32 %v270_v29, %v1093_v63  ;;  %v199_v32 = vpop.f32.mrb[14].mxu0  ;;  %v272_v33 = vpop.f32.mrb[14].mxu1  ;;  %636 = vmatprep.mubr.bf16.mxu0 %v318_v22  ;;  %701 = vmatprep.mubr.bf16.mxu1 %v320_v23 }
 0x10b   :  { %v303_v34 = vmax.f32 %v269_v27, 0.0  ;;  %v200_v35 = vadd.f32 %v199_v32, %v1087_v60  ;;  %v273_v36 = vadd.f32 %v272_v33, %v1089_v61  ;;  %v201_v37 = vpop.f32.mrb[15].mxu0  ;;  %v274_v38 = vpop.f32.mrb[15].mxu1  ;;  %637 = vmatmul.mubr.bf16.gmra.mrb[24].mxu0 %v317_v20  ;;  %702 = vmatmul.mubr.bf16.gmra.mrb[24].mxu1 %v319_v21  ;;  %v301_v42 = vmax.f32 %v196_v26, 0.0 }
 0x10c   :  { %v304_v39 = vmax.f32 %v271_v31, 0.0  ;;  %v202_v40 = vadd.f32 %v201_v37, %v1091_v62  ;;  %v275_v41 = vadd.f32 %v274_v38, %v1093_v63  ;;  %v302_v45 = vmax.f32 %v198_v30, 0.0  ;;  %v1130_v62 = vld [vmem:[%s1156_s4] ss:$0 sm:$0xff]  ;;  %s975_s4 = smov [#allocation5]  }
 0x10d   :  { %v305_v43 = vmax.f32 %v200_v35, 0.0  ;;  %v307_v44 = vmax.f32 %v273_v36, 0.0  ;;  %s731_s13 = sshll.u32 %s975_s4, 4  ;;  %s732_s13 = int_to_ptr.vmem [resolvable:$true] %s731_s13 }
 0x10e   :  { %v306_v46 = vmax.f32 %v202_v40, 0.0  ;;  %v308_v47 = vmax.f32 %v275_v41, 0.0  ;;  %s945_s14 = scalar_lea.vmem %s732_s13, 1024  ;;  %p950_p9 = scmp.lt.s32.totalorder %s732_s13, %s732_s13 }
 0x10f   :  { %v321_v48 = vpack.c.bf16 %v305_v43, %v301_v42  ;;  %v323_v49 = vpack.c.bf16 %v307_v44, %v303_v34  ;;  %p946_p8 = scmp.ne.s32.totalorder %s732_s13, %s945_s14  ;;  %p951_p10 = scmp.lt.s32.totalorder %s945_s14, %s945_s14 }
 0x110   :  { %v322_v60 = vpack.c.bf16 %v306_v46, %v302_v45  ;;  %v324_v50 = vpack.c.bf16 %v308_v47, %v304_v39 }
 0x111   :  { %p952_p11 = por %p951_p10, %p950_p9 }
 0x112   :  { %644 = vmatprep.mubr.bf16.mxu0 %v322_v60  ;;  %709 = vmatprep.mubr.bf16.mxu1 %v324_v50 }
 0x113   :  { %645 = vmatmul.mubr.bf16.gmra.mrb[28].mxu0 %v321_v48  ;;  %710 = vmatmul.mubr.bf16.gmra.mrb[28].mxu1 %v323_v49  ;;  %p953_p12 = pnand %p952_p11, %p946_p8 }
 0x1ce   :  { %v808_v61 = vpop.f32.mrb[16].mxu0  ;;  %v848_v51 = vpop.f32.mrb[16].mxu1 }
 0x1cf   :  { %v809_v63 = vpop.f32.mrb[17].mxu0  ;;  %v849_v52 = vpop.f32.mrb[17].mxu1 }
 0x1d0   :  { %v810_v53 = vadd.f32 %v809_v63, %v808_v61  ;;  %v850_v54 = vadd.f32 %v849_v52, %v848_v51  ;;  %v811_v55 = vpop.f32.mrb[18].mxu0  ;;  %v851_v56 = vpop.f32.mrb[18].mxu1 }
 0x1d1   :  { %v812_v57 = vpop.f32.mrb[19].mxu0  ;;  %v852_v58 = vpop.f32.mrb[19].mxu1 }
 0x1d2   :  { %v623_v59 = vadd.f32 %v810_v53, %v1130_v62  ;;  %v813_v0 = vadd.f32 %v812_v57, %v811_v55  ;;  %v853_v1 = vadd.f32 %v852_v58, %v851_v56 }
 0x1d4   :  { %v688_v2 = vadd.f32 %v850_v54, %v623_v59  ;;  %v626_v3 = vadd.f32 %v813_v0, %v1130_v62 }
 0x1d6   :  { %718 = vst [vmem:[#allocation5] sm:$0xff] %v688_v2  ;;  %v691_v4 = vadd.f32 %v853_v1, %v626_v3  ;;  %v814_v5 = vpop.f32.mrb[20].mxu0  ;;  %v854_v6 = vpop.f32.mrb[20].mxu1 }
 0x1d7   :  { %v815_v7 = vpop.f32.mrb[21].mxu0  ;;  %v855_v8 = vpop.f32.mrb[21].mxu1 }
 0x1d8   :  { %719 = vst [vmem:[#allocation5 + $0x8] sm:$0xff] %v691_v4  ;;  %v816_v9 = vadd.f32 %v815_v7, %v814_v5  ;;  %v856_v10 = vadd.f32 %v855_v8, %v854_v6  ;;  %v817_v11 = vpop.f32.mrb[22].mxu0  ;;  %v857_v12 = vpop.f32.mrb[22].mxu1 }
 0x1d9   :  { %v818_v13 = vpop.f32.mrb[23].mxu0  ;;  %v858_v14 = vpop.f32.mrb[23].mxu1 }
 0x1da   :  { %v631_v15 = vadd.f32 %v816_v9, %v1130_v62  ;;  %v819_v16 = vadd.f32 %v818_v13, %v817_v11  ;;  %v859_v17 = vadd.f32 %v858_v14, %v857_v12 }
 0x1dc   :  { %v696_v18 = vadd.f32 %v856_v10, %v631_v15  ;;  %v634_v19 = vadd.f32 %v819_v16, %v1130_v62 }
 0x1de   :  { %720 = vst [vmem:[#allocation5 + $0x10] sm:$0xff] %v696_v18  ;;  %v699_v20 = vadd.f32 %v859_v17, %v634_v19  ;;  %v820_v21 = vpop.f32.mrb[24].mxu0  ;;  %v860_v22 = vpop.f32.mrb[24].mxu1 }
 0x1df   :  { %v821_v23 = vpop.f32.mrb[25].mxu0  ;;  %v861_v24 = vpop.f32.mrb[25].mxu1 }
 0x1e0   :  { %721 = vst [vmem:[#allocation5 + $0x18] sm:$0xff] %v699_v20  ;;  %v822_v25 = vadd.f32 %v821_v23, %v820_v21  ;;  %v862_v26 = vadd.f32 %v861_v24, %v860_v22  ;;  %v823_v27 = vpop.f32.mrb[26].mxu0  ;;  %v863_v28 = vpop.f32.mrb[26].mxu1 }
 0x1e1   :  { %v824_v29 = vpop.f32.mrb[27].mxu0  ;;  %v864_v30 = vpop.f32.mrb[27].mxu1 }
 0x1e2   :  { %v639_v31 = vadd.f32 %v822_v25, %v1130_v62  ;;  %v825_v32 = vadd.f32 %v824_v29, %v823_v27  ;;  %v865_v33 = vadd.f32 %v864_v30, %v863_v28 }
 0x1e4   :  { %v704_v34 = vadd.f32 %v862_v26, %v639_v31  ;;  %v642_v35 = vadd.f32 %v825_v32, %v1130_v62 }
 0x1e6   :  { %722 = vst [vmem:[#allocation5 + $0x20] sm:$0xff] %v704_v34  ;;  %v707_v36 = vadd.f32 %v865_v33, %v642_v35  ;;  %v826_v37 = vpop.f32.mrb[28].mxu0  ;;  %v866_v38 = vpop.f32.mrb[28].mxu1 }
 0x1e7   :  { %v827_v39 = vpop.f32.mrb[29].mxu0  ;;  %v867_v40 = vpop.f32.mrb[29].mxu1 }
 0x1e8   :  { %723 = vst [vmem:[#allocation5 + $0x28] sm:$0xff] %v707_v36  ;;  %v828_v41 = vadd.f32 %v827_v39, %v826_v37  ;;  %v868_v42 = vadd.f32 %v867_v40, %v866_v38  ;;  %v829_v43 = vpop.f32.mrb[30].mxu0  ;;  %v869_v44 = vpop.f32.mrb[30].mxu1 }
 0x1e9   :  { %v830_v45 = vpop.f32.mrb[31].mxu0  ;;  %v870_v46 = vpop.f32.mrb[31].mxu1 }
 0x1ea   :  { %v647_v47 = vadd.f32 %v828_v41, %v1130_v62  ;;  %v831_v48 = vadd.f32 %v830_v45, %v829_v43  ;;  %v871_v49 = vadd.f32 %v870_v46, %v869_v44 }
 0x1ec   :  { %v712_v60 = vadd.f32 %v868_v42, %v647_v47  ;;  %v650_v50 = vadd.f32 %v831_v48, %v1130_v62 }
 0x1ee   :  { %724 = vst [vmem:[#allocation5 + $0x30] sm:$0xff] %v712_v60  ;;  %v715_v61 = vadd.f32 %v871_v49, %v650_v50 }
 0x1f0   :  { %725 = vst [vmem:[#allocation5 + $0x38] sm:$0xff] %v715_v61 }
 0x1f1   :  { %956 = shalt.err (!%p953_p12)
}
 0x1f2   :  { %s957_s17 = scalar_lea.hbm %s1157_s5, 1024 }
 0x1f3   :  { %p958_p13 = scmp.ne.s32.totalorder %s1157_s5, %s957_s17  ;;  %p961_p0 = scmp.lt.u32.totalorder %s957_s17, %s1157_s5 }
 0x1f5   :  { %p963_p1 = pnand %p961_p0, %p958_p13 }
 0x1f7   :  { %966 = shalt.err (!%p963_p1)
}
 0x1f8   :  { %s976_s22 = smov 128   ;;  %s977_s23 = smov 8  }
 0x1f9   :  { %737 = dma.vmem_to_hbm [thread:$0]  %s732_s13, 1024, %s1157_s5, [#allocation4], %s976_s22, %s976_s22, %s977_s23  }
 0x1fa   :  { %969 = dma.done.wait [#allocation4], 1024  }
 0x1fb   :  { %970 = vsyncadd [#allocation4], 4294966272 }
 0x1fc   :  { %741 = vsyncpa [#allocation3], 1 }
 0x1fd   :  { %742 = vsyncpa [#allocation4], 1 }

</bundles_post_ra>
